<compile_context>
chip_gen: v7x
topology: tpu7x:2x2x1
jax: 0.10.0
libtpu: 0.0.40
codegen_flags: <defaults>
</compile_context>

<pallas_src>
import functools

import jax
import jax.numpy as jnp
from jax.experimental import pallas as pl
from jax.experimental.pallas import tpu as pltpu


def _round_up(x: int, m: int) -> int:
    return ((x + m - 1) // m) * m


def _cdiv(a: int, b: int) -> int:
    return -(-a // b)


def _balanced_tile(dim: int, target: int, mult: int) -> int:
    """Largest ~target tile (multiple of `mult`) giving balanced blocks over `dim`."""
    nb = max(1, _cdiv(dim, target))
    t = _round_up(_cdiv(dim, nb), mult)
    return max(mult, min(t, _round_up(dim, mult)))


def _vmem_budgets():
    """(resident-weight threshold, pipeline footprint budget, vmem_limit cap) per chip gen."""
    try:
        cap = int(pltpu.get_tpu_info().vmem_capacity_bytes)
    except Exception:  # conservative default that is safe on every generation
        cap = 64 * 1024 * 1024
    mib = 1024 * 1024
    if cap >= 96 * mib:                      # v5e / v6e: 128 MiB VMEM per TensorCore
        return 48 * mib, 88 * mib, 96 * mib
    return 20 * mib, 36 * mib, 42 * mib      # v7x: 64 MiB VMEM per TensorCore


def _compiler_params(semantics, footprint_bytes, limit_cap):
    limit = int(min(limit_cap, max(footprint_bytes * 1.3, 16 * 1024 * 1024)))
    return pltpu.CompilerParams(dimension_semantics=semantics, vmem_limit_bytes=limit)


# ---------------------------------------------------------------------------------------
# Primary kernel: full (K, F) weight resident in VMEM, single MXU pass over K,
# only the node axis is tiled (1-D "parallel" grid), relu fused into the store.
# ---------------------------------------------------------------------------------------
def _resident_weight_kernel(x_ref, w_ref, o_ref, *, apply_relu):
    h = jnp.dot(x_ref[...], w_ref[...], preferred_element_type=jnp.float32)
    if apply_relu:
        h = jnp.maximum(h, 0.0)
    o_ref[...] = h.astype(o_ref.dtype)


# ---------------------------------------------------------------------------------------
# Fallback kernel (weight too large for VMEM): (N, F, K) tiling, f32 accumulator,
# reduction axis last and marked "arbitrary".
# ---------------------------------------------------------------------------------------
def _tiled_kernel(x_ref, w_ref, o_ref, acc_ref, *, apply_relu):
    kk = pl.program_id(2)

    @pl.when(kk == 0)
    def _():
        acc_ref[...] = jnp.zeros_like(acc_ref)

    acc_ref[...] += jnp.dot(x_ref[...], w_ref[...], preferred_element_type=jnp.float32)

    @pl.when(kk == pl.num_programs(2) - 1)
    def _():
        h = acc_ref[...]
        if apply_relu:
            h = jnp.maximum(h, 0.0)
        o_ref[...] = h.astype(o_ref.dtype)


def node_apply(x, weight, *, activation="relu", compute_dtype=None, _force_fallback=False):
    """activation(x @ weight.T); weight is (out_feats, in_feats) like torch.nn.Linear."""
    if activation not in ("relu", None, "none", "identity"):
        raise ValueError(f"unsupported activation: {activation!r}")
    apply_relu = activation == "relu"

    n, k = x.shape
    f, k_w = weight.shape
    assert k == k_w, "in_feats mismatch between features and weight"

    out_dtype = x.dtype
    if compute_dtype is not None:            # opt-in low-precision MXU path (f32 accumulation)
        x = x.astype(compute_dtype)
        weight = weight.astype(compute_dtype)

    bpe_x = jnp.dtype(x.dtype).itemsize
    bpe_w = jnp.dtype(weight.dtype).itemsize
    bpe_o = jnp.dtype(out_dtype).itemsize
    row_mult = {4: 8, 2: 16, 1: 32}.get(bpe_x, 8)     # sublane packing for the row axis

    resident_thresh, pipeline_budget, limit_cap = _vmem_budgets()

    f_pad = _round_up(f, 128)                # lane-dense output / weight columns
    w_resident_bytes = k * f_pad * bpe_w     # single-buffered resident weight

    def primary_footprint(tm_):
        return (2 * tm_ * k * bpe_x          # double-buffered x tiles
                + k * f_pad * bpe_w          # resident weight (one buffer)
                + 2 * tm_ * f_pad * bpe_o    # double-buffered output tiles
                + tm_ * f_pad * 4)           # f32 matmul result before the cast

    # ---------------- Primary path: whole weight resident in VMEM ----------------
    if not _force_fallback and w_resident_bytes <= resident_thresh:
        nb = max(1, _cdiv(n, 512))
        if n >= 512:
            nb = max(nb, 2)                  # keep both TensorCores busy on 2-TC chips
        if n >= 1024 and nb % 2:
            nb += 1                          # even block count balances the 2 TCs
        tm = _round_up(_cdiv(n, nb), row_mult)
        tm = min(tm, _round_up(n, row_mult))
        while primary_footprint(tm) > pipeline_budget and tm > 128:
            tm = max(128, _round_up(tm // 2, row_mult))

        if primary_footprint(tm) <= pipeline_budget:
            n_pad = _round_up(n, tm)
            # Prefer a row tile that divides N exactly -> no jnp.pad copy of x at all.
            if n_pad != n and n % row_mult == 0:
                hi = min(tm, n)
                hi -= hi % row_mult
                for cand in range(hi, 127, -row_mult):
                    if n % cand == 0 and primary_footprint(cand) <= pipeline_budget:
                        tm, n_pad = cand, n
                        break
            # TODO(synk): when n_pad != n, handle the ragged last row-block with a tiny
            # second pallas_call instead of this whole-array pad copy of x.
            x_p = jnp.pad(x, ((0, n_pad - n), (0, 0))) if n_pad != n else x
            w_p = weight.T                               # one-time HBM transpose -> (K, F)
            if f_pad != f:
                w_p = jnp.pad(w_p, ((0, 0), (0, f_pad - f)))

            kernel = functools.partial(_resident_weight_kernel, apply_relu=apply_relu)
            params = _compiler_params(("parallel",), primary_footprint(tm), limit_cap)

            def run(single_buffer_weight):
                w_kwargs = (
                    {"pipeline_mode": pl.Buffered(1)} if single_buffer_weight else {}
                )
                return pl.pallas_call(
                    kernel,
                    out_shape=jax.ShapeDtypeStruct((n_pad, f_pad), out_dtype),
                    grid_spec=pltpu.PrefetchScalarGridSpec(
                        num_scalar_prefetch=0,
                        grid=(n_pad // tm,),
                        in_specs=[
                            pl.BlockSpec((tm, k), lambda i: (i, 0)),
                            # Constant block index -> DMA'd once, stays resident in VMEM.
                            pl.BlockSpec((k, f_pad), lambda i: (0, 0), **w_kwargs),
                        ],
                        out_specs=pl.BlockSpec((tm, f_pad), lambda i: (i, 0)),
                    ),
                    compiler_params=params,
                )(x_p, w_p)

            try:
                out = run(True)
            except Exception:
                # jax version without Buffered(1) support: default double-buffering.
                out = run(False)

            if n_pad != n or f_pad != f:
                out = out[:n, :f]
            return out

    # ---------------- Fallback: stream the weight (3-D tiled matmul) ----------------
    tm = _balanced_tile(n, 1024, row_mult)   # big tm => W slab re-read fewer times
    tn = _balanced_tile(f_pad, 512, 128)
    tk = _balanced_tile(_round_up(k, 128), 512, 128)

    def fb_footprint(tm_, tn_, tk_):
        return (2 * tm_ * tk_ * bpe_x + 2 * tk_ * tn_ * bpe_w
                + 2 * tm_ * tn_ * bpe_o + tm_ * tn_ * 4)

    while fb_footprint(tm, tn, tk) > pipeline_budget and tk > 128:
        tk = max(128, _round_up(tk // 2, 128))
    while fb_footprint(tm, tn, tk) > pipeline_budget and tn > 128:
        tn = max(128, _round_up(tn // 2, 128))
    while fb_footprint(tm, tn, tk) > pipeline_budget and tm > 256:
        tm = max(256, _round_up(tm // 2, row_mult))

    n_pad = _round_up(n, tm)
    f_fin = _round_up(f_pad, tn)
    k_fin = _round_up(k, tk)

    x_p = jnp.pad(x, ((0, n_pad - n), (0, k_fin - k))) if (n_pad != n or k_fin != k) else x
    w_p = weight.T                                        # one-time transpose -> (K, F)
    if k_fin != k or f_fin != f:
        w_p = jnp.pad(w_p, ((0, k_fin - k), (0, f_fin - f)))

    kernel = functools.partial(_tiled_kernel, apply_relu=apply_relu)
    out = pl.pallas_call(
        kernel,
        out_shape=jax.ShapeDtypeStruct((n_pad, f_fin), out_dtype),
        grid_spec=pltpu.PrefetchScalarGridSpec(
            num_scalar_prefetch=0,
            grid=(n_pad // tm, f_fin // tn, k_fin // tk),
            in_specs=[
                pl.BlockSpec((tm, tk), lambda i, j, kk: (i, kk)),
                pl.BlockSpec((tk, tn), lambda i, j, kk: (kk, j)),
            ],
            out_specs=pl.BlockSpec((tm, tn), lambda i, j, kk: (i, j)),
            scratch_shapes=[pltpu.VMEM((tm, tn), jnp.float32)],
        ),
        compiler_params=_compiler_params(
            ("parallel", "parallel", "arbitrary"), fb_footprint(tm, tn, tk), limit_cap),
    )(x_p, w_p)
    return out[:n, :f]


if __name__ == "__main__":
    # NodeApplyModule forward:  h_out = activation(Linear_no_bias(node.data['h']))
    #   node.data['h'] : [num_nodes, in_feats]
    #   nn.Linear(in_feats, out_feats, bias=False).weight : [out_feats, in_feats]
    num_nodes, in_feats, out_feats = 256, 256, 128

    key = jax.random.PRNGKey(0)
    kx, kw = jax.random.split(key)
    h = jax.random.normal(kx, (num_nodes, in_feats), dtype=jnp.float32)
    bound = 1.0 / (in_feats ** 0.5)
    weight = jax.random.uniform(
        kw, (out_feats, in_feats), dtype=jnp.float32, minval=-bound, maxval=bound
    )

    out = node_apply(h, weight, activation="relu")
    jax.block_until_ready(out)
    ref = jnp.maximum(h @ weight.T, 0.0)
    assert out.shape == (num_nodes, out_feats)
    assert jnp.allclose(out, ref, atol=1e-5, rtol=1e-5)

    # Ragged / non-128 shapes: exercises F-padding for a lane-dense output.
    kx2, kw2 = jax.random.split(jax.random.PRNGKey(0), 2)
    h2 = jax.random.normal(kx2, (200, 96), dtype=jnp.float32)
    w2 = jax.random.uniform(kw2, (56, 96), dtype=jnp.float32, minval=-0.1, maxval=0.1)
    out2 = node_apply(h2, w2, activation="relu")
    jax.block_until_ready(out2)
    ref2 = jnp.maximum(h2 @ w2.T, 0.0)
    assert out2.shape == (200, 56)
    assert jnp.allclose(out2, ref2, atol=1e-5, rtol=1e-5)

    # Opt-in bf16 compute path (halves HBM input traffic, f32 accumulation).
    out3 = node_apply(h, weight, activation="relu", compute_dtype=jnp.bfloat16)
    jax.block_until_ready(out3)
    assert out3.shape == (num_nodes, out_feats)
    assert out3.dtype == jnp.float32
    assert jnp.allclose(out3, ref, atol=5e-2, rtol=5e-2)

    # Streamed-weight fallback path (forced here; real trigger is W too big for VMEM).
    out4 = node_apply(h2, w2, activation="relu", _force_fallback=True)
    jax.block_until_ready(out4)
    assert jnp.allclose(out4, ref2, atol=1e-5, rtol=1e-5)

    print("KERNEL_OK")
</pallas_src>

<mosaic_0001>
module attributes {stable_mosaic.version = 11 : i64} {
  func.func @_resident_weight_kernel(%arg0: i32, %arg1: memref<256x256xf32, #tpu.memory_space<vmem>>, %arg2: memref<256x128xf32, #tpu.memory_space<vmem>>, %arg3: memref<256x128xf32, #tpu.memory_space<vmem>>) attributes {dimension_semantics = [#tpu.dimension_semantics<parallel>], iteration_bounds = array<i64: 1>, scalar_prefetch = 0 : i64, scratch_operands = 0 : i64, tpu.core_type = #tpu.core_type<tc>, window_params = [{transform_indices = @transform_0, window_bounds = array<i64: 256, 256>}, {pipeline_mode = #tpu.pipeline_mode<synchronous>, transform_indices = @transform_1, window_bounds = array<i64: 256, 128>}, {transform_indices = @transform_2, window_bounds = array<i64: 256, 128>}]} {
    %c0 = arith.constant 0 : index
    %c0_0 = arith.constant 0 : index
    %0 = vector.load %arg1[%c0, %c0_0] : memref<256x256xf32, #tpu.memory_space<vmem>>, vector<256x256xf32>
    %c0_1 = arith.constant 0 : index
    %c0_2 = arith.constant 0 : index
    %1 = vector.load %arg2[%c0_1, %c0_2] : memref<256x128xf32, #tpu.memory_space<vmem>>, vector<256x128xf32>
    %cst = arith.constant dense<0.000000e+00> : vector<256x128xf32>
    %2 = tpu.matmul %0, %1, %cst {dimension_numbers = #tpu.dot_dimension_numbers<[1], [0], [0], [1], [0, 0, 1, 1], [], []>} : vector<256x256xf32>, vector<256x128xf32>, vector<256x128xf32> -> vector<256x128xf32>
    %cst_3 = arith.constant 0.000000e+00 : f32
    %3 = vector.broadcast %cst_3 : f32 to vector<256x128xf32>
    %4 = arith.maximumf %2, %3 : vector<256x128xf32>
    %c0_4 = arith.constant 0 : index
    %c0_5 = arith.constant 0 : index
    %5 = vector.load %arg3[%c0_4, %c0_5] : memref<256x128xf32, #tpu.memory_space<vmem>>, vector<256x128xf32>
    tpu.vector_store %arg3[%c0_4, %c0_5], %4 {strides = array<i32>} : memref<256x128xf32, #tpu.memory_space<vmem>>, vector<256x128xf32>,
    return
  }
  func.func @transform_0(%arg0: i32) -> (i32, i32) {
    %c0_i32 = arith.constant 0 : i32
    %c0_i32_0 = arith.constant 0 : i32
    return %arg0, %c0_i32 : i32, i32
  }
  func.func @transform_1(%arg0: i32) -> (i32, i32) {
    %c0_i32 = arith.constant 0 : i32
    %c0_i32_0 = arith.constant 0 : i32
    %c0_i32_1 = arith.constant 0 : i32
    return %c0_i32, %c0_i32_0 : i32, i32
  }
  func.func @transform_2(%arg0: i32) -> (i32, i32) {
    %c0_i32 = arith.constant 0 : i32
    %c0_i32_0 = arith.constant 0 : i32
    return %arg0, %c0_i32 : i32, i32
  }
}

module attributes {stable_mosaic.version = 11 : i64} {
  func.func @_resident_weight_kernel(%arg0: i32, %arg1: memref<256x256xf32, #tpu.memory_space<vmem>>, %arg2: memref<256x128xf32, #tpu.memory_space<vmem>>, %arg3: memref<256x128xf32, #tpu.memory_space<vmem>>) attributes {dimension_semantics = [#tpu.dimension_semantics<parallel>], iteration_bounds = array<i64: 1>, scalar_prefetch = 0 : i64, scratch_operands = 0 : i64, tpu.core_type = #tpu.core_type<tc>, window_params = [{transform_indices = @transform_0, window_bounds = array<i64: 256, 256>}, {pipeline_mode = #tpu.pipeline_mode<synchronous>, transform_indices = @transform_1, window_bounds = array<i64: 256, 128>}, {transform_indices = @transform_2, window_bounds = array<i64: 256, 128>}]} {
    %c0 = arith.constant 0 : index
    %c0_0 = arith.constant 0 : index
    %0 = vector.load %arg1[%c0, %c0_0] : memref<256x256xf32, #tpu.memory_space<vmem>>, vector<256x256xf32>
    %c0_1 = arith.constant 0 : index
    %c0_2 = arith.constant 0 : index
    %1 = vector.load %arg2[%c0_1, %c0_2] : memref<256x128xf32, #tpu.memory_space<vmem>>, vector<256x128xf32>
    %cst = arith.constant dense<0.000000e+00> : vector<256x128xf32>
    %2 = tpu.matmul %0, %1, %cst {dimension_numbers = #tpu.dot_dimension_numbers<[1], [0], [0], [1], [0, 0, 1, 1], [], []>} : vector<256x256xf32>, vector<256x128xf32>, vector<256x128xf32> -> vector<256x128xf32>
    %cst_3 = arith.constant 0.000000e+00 : f32
    %3 = vector.broadcast %cst_3 : f32 to vector<256x128xf32>
    %4 = arith.maximumf %2, %3 : vector<256x128xf32>
    %c0_4 = arith.constant 0 : index
    %c0_5 = arith.constant 0 : index
    %5 = vector.load %arg3[%c0_4, %c0_5] : memref<256x128xf32, #tpu.memory_space<vmem>>, vector<256x128xf32>
    tpu.vector_store %arg3[%c0_4, %c0_5], %4 {strides = array<i32>} : memref<256x128xf32, #tpu.memory_space<vmem>>, vector<256x128xf32>,
    return
  }
  func.func @transform_0(%arg0: i32) -> (i32, i32) {
    %c0_i32 = arith.constant 0 : i32
    %c0_i32_0 = arith.constant 0 : i32
    return %arg0, %c0_i32 : i32, i32
  }
  func.func @transform_1(%arg0: i32) -> (i32, i32) {
    %c0_i32 = arith.constant 0 : i32
    %c0_i32_0 = arith.constant 0 : i32
    %c0_i32_1 = arith.constant 0 : i32
    return %c0_i32, %c0_i32_0 : i32, i32
  }
  func.func @transform_2(%arg0: i32) -> (i32, i32) {
    %c0_i32 = arith.constant 0 : i32
    %c0_i32_0 = arith.constant 0 : i32
    return %arg0, %c0_i32 : i32, i32
  }
}

</mosaic_0001>

<bundles_post_ra>
// kernel: tpu_custom_call.1
= control target key start
LH: loop header
LB: loop body
LE: loop exit
PB: predicated region body
PF: predicated region fallthrough
CT: control target
= control target key end

     0   :  { %7 = vsyncpa [#allocation3], 0  ;;  %s700_s0 = inlined_call_operand.hbm [shape: f32[256,256], index: 0, kind: input, shape index: {}]   ;;  %s701_s1 = inlined_call_operand.hbm [shape: f32[256,128], index: 1, kind: input, shape index: {}]   ;;  %s702_s2 = inlined_call_operand.hbm [shape: f32[256,128], index: 2, kind: output, shape index: {}]  }
   0x1   :  { %8 = vsyncpa [#allocation6], 0 }
   0x2   :  { %9 = vsyncpa [#allocation4], 0  ;;  %s603_s9 = smov [#allocation2]   ;;  %s531_s13 = scalar_lea.hbm %s700_s0, 8192 }
   0x3   :  { %s15_s10 = sshll.u32 %s603_s9, 4  ;;  %p532_p0 = scmp.ne.s32.totalorder %s700_s0, %s531_s13  ;;  %s16_s10 = int_to_ptr.vmem [resolvable:$true] %s15_s10 }
   0x4   :  { %p535_p1 = scmp.lt.u32.totalorder %s531_s13, %s700_s0 }
   0x6   :  { %p537_p2 = pnand %p535_p1, %p532_p0 }
   0x8   :  { %540 = shalt.err (!%p537_p2)
}
   0x9   :  { %s541_s18 = scalar_lea.vmem %s16_s10, 8192  ;;  %p546_p4 = scmp.lt.s32.totalorder %s16_s10, %s16_s10 }
   0xa   :  { %p542_p3 = scmp.ne.s32.totalorder %s16_s10, %s541_s18  ;;  %p547_p5 = scmp.lt.s32.totalorder %s541_s18, %s541_s18 }
   0xc   :  { %p548_p6 = por %p547_p5, %p546_p4 }
   0xe   :  { %p549_p7 = pnand %p548_p6, %p542_p3 }
  0x10   :  { %552 = shalt.err (!%p549_p7)
}
  0x11   :  { %s604_s19 = smov 256   ;;  %s605_s20 = smov 16  }
  0x12   :  { %21 = dma.hbm_to_vmem [thread:$0]  %s700_s0, 8192, %s16_s10, [#allocation3], %s604_s19, %s604_s19, %s605_s20  }
  0x13   :  { %s606_s23 = smov [#allocation5]   ;;  %s553_s27 = scalar_lea.hbm %s701_s1, 4096 }
  0x14   :  { %s27_s24 = sshll.u32 %s606_s23, 4  ;;  %p554_p8 = scmp.ne.s32.totalorder %s701_s1, %s553_s27  ;;  %s28_s24 = int_to_ptr.vmem [resolvable:$true] %s27_s24 }
  0x15   :  { %p557_p9 = scmp.lt.u32.totalorder %s553_s27, %s701_s1 }
  0x17   :  { %p559_p10 = pnand %p557_p9, %p554_p8 }
  0x19   :  { %562 = shalt.err (!%p559_p10)
}
  0x1a   :  { %s563_s4 = scalar_lea.vmem %s28_s24, 4096  ;;  %p568_p12 = scmp.lt.s32.totalorder %s28_s24, %s28_s24 }
  0x1b   :  { %p564_p11 = scmp.ne.s32.totalorder %s28_s24, %s563_s4  ;;  %p569_p13 = scmp.lt.s32.totalorder %s563_s4, %s563_s4 }
  0x1d   :  { %p570_p0 = por %p569_p13, %p568_p12 }
  0x1f   :  { %p571_p1 = pnand %p570_p0, %p564_p11 }
  0x21   :  { %574 = shalt.err (!%p571_p1)
}
  0x22   :  { %s607_s0 = smov 128   ;;  %s608_s5 = smov 8  }
  0x23   :  { %33 = dma.hbm_to_vmem [thread:$0]  %s701_s1, 4096, %s28_s24, [#allocation6], %s607_s0, %s607_s0, %s608_s5  }
  0x24   :  { %597 = dma.done.wait [#allocation3], 8192  }
  0x25   :  { %598 = vsyncadd [#allocation3], 4294959104 }
  0x26   :  { %599 = dma.done.wait [#allocation6], 4096  }
  0x27   :  { %600 = vsyncadd [#allocation6], 4294963200  ;;  %v609_v0 = vmov 0.0|0.0   ;;  %v104_v1 = vld [vmem:[#allocation5] sm:$0xff]  ;;  %v105_v2 = vld [vmem:[#allocation5 + $0x8] sm:$0xff]  ;;  %s610_s1 = smov [#allocation7]  }
  0x28   :  { %443 = vmatprep.subr.bf16.mxu0 %v609_v0  ;;  %491 = vmatprep.subr.bf16.mxu1 %v609_v0  ;;  %v106_v3 = vld [vmem:[#allocation5 + $0x10] sm:$0xff]  ;;  %v444_v4 = vpack.c.bf16 %v105_v2, %v104_v1  ;;  %v107_v5 = vld [vmem:[#allocation5 + $0x18] sm:$0xff]  ;;  %v108_v7 = vld [vmem:[#allocation5 + $0x20] sm:$0xff]  ;;  %s430_s8 = sshll.u32 %s610_s1, 4  ;;  %s431_s8 = int_to_ptr.vmem [resolvable:$true] %s430_s8 }
  0x29   :  { %v447_v6 = vpack.c.bf16 %v107_v5, %v106_v3  ;;  %v109_v8 = vld [vmem:[#allocation5 + $0x28] sm:$0xff]  ;;  %v110_v10 = vld [vmem:[#allocation5 + $0x30] sm:$0xff]  ;;  %v111_v11 = vld [vmem:[#allocation5 + $0x38] sm:$0xff]  ;;  %s575_s9 = scalar_lea.vmem %s431_s8, 4096  ;;  %p580_p3 = scmp.lt.s32.totalorder %s431_s8, %s431_s8 }
  0x2a   :  { %445 = vmatpush1.bf16.msra.mxu0 %v444_v4  ;;  %507 = vmatpush1.bf16.msra.mxu1 %v444_v4  ;;  %v450_v9 = vpack.c.bf16 %v109_v8, %v108_v7  ;;  %v41_v12 = vld [vmem:[#allocation2 + $0x8] sm:$0xff]  ;;  %v453_v13 = vpack.c.bf16 %v111_v11, %v110_v10  ;;  %v112_v15 = vld [vmem:[#allocation5 + $0x40] sm:$0xff]  ;;  %v114_v18 = vld [vmem:[#allocation5 + $0x50] sm:$0xff]  ;;  %p576_p2 = scmp.ne.s32.totalorder %s431_s8, %s575_s9  ;;  %p581_p4 = scmp.lt.s32.totalorder %s575_s9, %s575_s9 }
  0x2b   :  { %446 = vmatprep.subr.bf16.mxu0 %v609_v0  ;;  %492 = vmatprep.subr.bf16.mxu1 %v609_v0  ;;  %v73_v14 = vld [vmem:[#allocation2 + $0x108] sm:$0xff]  ;;  %v115_v19 = vld [vmem:[#allocation5 + $0x58] sm:$0xff]  ;;  %v116_v21 = vld [vmem:[#allocation5 + $0x60] sm:$0xff] }
  0x2c   :  { %v113_v16 = vld [vmem:[#allocation5 + $0x48] sm:$0xff]  ;;  %200 = vmatprep.mubr.f32.mxu0 %v41_v12  ;;  %280 = vmatprep.mubr.f32.mxu1 %v73_v14  ;;  %v459_v20 = vpack.c.bf16 %v115_v19, %v114_v18  ;;  %v118_v24 = vld [vmem:[#allocation5 + $0x70] sm:$0xff]  ;;  %v119_v25 = vld [vmem:[#allocation5 + $0x78] sm:$0xff]  ;;  %p582_p5 = por %p581_p4, %p580_p3 }
  0x2d   :  { %v456_v17 = vpack.c.bf16 %v113_v16, %v112_v15  ;;  %v117_v22 = vld [vmem:[#allocation5 + $0x68] sm:$0xff]  ;;  %v465_v26 = vpack.c.bf16 %v119_v25, %v118_v24  ;;  %v120_v27 = vld [vmem:[#allocation5 + $0x80] sm:$0xff]  ;;  %v122_v30 = vld [vmem:[#allocation5 + $0x90] sm:$0xff] }
  0x2e   :  { %448 = vmatpush1.bf16.msra.mxu0 %v447_v6  ;;  %508 = vmatpush1.bf16.msra.mxu1 %v447_v6  ;;  %v462_v23 = vpack.c.bf16 %v117_v22, %v116_v21  ;;  %v121_v28 = vld [vmem:[#allocation5 + $0x88] sm:$0xff]  ;;  %v123_v31 = vld [vmem:[#allocation5 + $0x98] sm:$0xff]  ;;  %v124_v33 = vld [vmem:[#allocation5 + $0xa0] sm:$0xff]  ;;  %p583_p6 = pnand %p582_p5, %p576_p2 }
  0x2f   :  { %449 = vmatprep.subr.bf16.mxu0 %v609_v0  ;;  %493 = vmatprep.subr.bf16.mxu1 %v609_v0  ;;  %v468_v29 = vpack.c.bf16 %v121_v28, %v120_v27  ;;  %v471_v32 = vpack.c.bf16 %v123_v31, %v122_v30  ;;  %v125_v34 = vld [vmem:[#allocation5 + $0xa8] sm:$0xff]  ;;  %v126_v36 = vld [vmem:[#allocation5 + $0xb0] sm:$0xff]  ;;  %v127_v37 = vld [vmem:[#allocation5 + $0xb8] sm:$0xff] }
  0x30   :  { %v474_v35 = vpack.c.bf16 %v125_v34, %v124_v33  ;;  %v477_v38 = vpack.c.bf16 %v127_v37, %v126_v36  ;;  %v128_v39 = vld [vmem:[#allocation5 + $0xc0] sm:$0xff]  ;;  %v129_v40 = vld [vmem:[#allocation5 + $0xc8] sm:$0xff]  ;;  %v130_v42 = vld [vmem:[#allocation5 + $0xd0] sm:$0xff] }
  0x31   :  { %v480_v41 = vpack.c.bf16 %v129_v40, %v128_v39  ;;  %v131_v43 = vld [vmem:[#allocation5 + $0xd8] sm:$0xff]  ;;  %v132_v45 = vld [vmem:[#allocation5 + $0xe0] sm:$0xff]  ;;  %v133_v46 = vld [vmem:[#allocation5 + $0xe8] sm:$0xff] }
  0x32   :  { %451 = vmatpush1.bf16.msra.mxu0 %v450_v9  ;;  %509 = vmatpush1.bf16.msra.mxu1 %v450_v9  ;;  %v483_v44 = vpack.c.bf16 %v131_v43, %v130_v42  ;;  %v486_v47 = vpack.c.bf16 %v133_v46, %v132_v45  ;;  %v134_v48 = vld [vmem:[#allocation5 + $0xf0] sm:$0xff]  ;;  %v135_v49 = vld [vmem:[#allocation5 + $0xf8] sm:$0xff]  ;;  %v40_v51 = vld [vmem:[#allocation2] sm:$0xff] }
  0x33   :  { %452 = vmatprep.subr.bf16.mxu0 %v609_v0  ;;  %494 = vmatprep.subr.bf16.mxu1 %v609_v0  ;;  %v489_v50 = vpack.c.bf16 %v135_v49, %v134_v48  ;;  %v72_v52 = vld [vmem:[#allocation2 + $0x100] sm:$0xff]  ;;  %v43_v53 = vld [vmem:[#allocation2 + $0x18] sm:$0xff]  ;;  %v42_v55 = vld [vmem:[#allocation2 + $0x10] sm:$0xff] }
  0x34   :  { %v75_v54 = vld [vmem:[#allocation2 + $0x118] sm:$0xff]  ;;  %v74_v56 = vld [vmem:[#allocation2 + $0x110] sm:$0xff]  ;;  %v45_v57 = vld [vmem:[#allocation2 + $0x28] sm:$0xff] }
  0x35   :  { %v77_v58 = vld [vmem:[#allocation2 + $0x128] sm:$0xff]  ;;  %v44_v59 = vld [vmem:[#allocation2 + $0x20] sm:$0xff]  ;;  %v47_v61 = vld [vmem:[#allocation2 + $0x38] sm:$0xff] }
  0x36   :  { %454 = vmatpush1.bf16.msra.mxu0 %v453_v13  ;;  %510 = vmatpush1.bf16.msra.mxu1 %v453_v13  ;;  %v76_v60 = vld [vmem:[#allocation2 + $0x120] sm:$0xff]  ;;  %v79_v62 = vld [vmem:[#allocation2 + $0x138] sm:$0xff]  ;;  %v46_v63 = vld [vmem:[#allocation2 + $0x30] sm:$0xff] }
  0x37   :  { %455 = vmatprep.subr.bf16.mxu0 %v609_v0  ;;  %495 = vmatprep.subr.bf16.mxu1 %v609_v0  ;;  %v49_v1 = vld [vmem:[#allocation2 + $0x48] sm:$0xff]  ;;  %v48_v3 = vld [vmem:[#allocation2 + $0x40] sm:$0xff]  ;;  %v51_v5 = vld [vmem:[#allocation2 + $0x58] sm:$0xff] }
  0x38   :  { %v81_v2 = vld [vmem:[#allocation2 + $0x148] sm:$0xff]  ;;  %v80_v4 = vld [vmem:[#allocation2 + $0x140] sm:$0xff]  ;;  %v83_v6 = vld [vmem:[#allocation2 + $0x158] sm:$0xff] }
  0x39   :  { %v50_v7 = vld [vmem:[#allocation2 + $0x50] sm:$0xff]  ;;  %v53_v9 = vld [vmem:[#allocation2 + $0x68] sm:$0xff]  ;;  %v52_v11 = vld [vmem:[#allocation2 + $0x60] sm:$0xff] }
  0x3a   :  { %457 = vmatpush1.bf16.msra.mxu0 %v456_v17  ;;  %511 = vmatpush1.bf16.msra.mxu1 %v456_v17  ;;  %v82_v8 = vld [vmem:[#allocation2 + $0x150] sm:$0xff]  ;;  %v85_v10 = vld [vmem:[#allocation2 + $0x168] sm:$0xff]  ;;  %v84_v12 = vld [vmem:[#allocation2 + $0x160] sm:$0xff] }
  0x3b   :  { %458 = vmatprep.subr.bf16.mxu0 %v609_v0  ;;  %496 = vmatprep.subr.bf16.mxu1 %v609_v0  ;;  %v55_v13 = vld [vmem:[#allocation2 + $0x78] sm:$0xff]  ;;  %v54_v15 = vld [vmem:[#allocation2 + $0x70] sm:$0xff]  ;;  %v57_v17 = vld [vmem:[#allocation2 + $0x88] sm:$0xff] }
  0x3c   :  { %v87_v14 = vld [vmem:[#allocation2 + $0x178] sm:$0xff]  ;;  %v86_v16 = vld [vmem:[#allocation2 + $0x170] sm:$0xff]  ;;  %v89_v18 = vld [vmem:[#allocation2 + $0x188] sm:$0xff] }
  0x3d   :  { %v56_v19 = vld [vmem:[#allocation2 + $0x80] sm:$0xff]  ;;  %v59_v21 = vld [vmem:[#allocation2 + $0x98] sm:$0xff]  ;;  %v90_v24 = vld [vmem:[#allocation2 + $0x190] sm:$0xff] }
  0x3e   :  { %460 = vmatpush1.bf16.msra.mxu0 %v459_v20  ;;  %512 = vmatpush1.bf16.msra.mxu1 %v459_v20  ;;  %v88_v20 = vld [vmem:[#allocation2 + $0x180] sm:$0xff]  ;;  %v91_v22 = vld [vmem:[#allocation2 + $0x198] sm:$0xff]  ;;  %v61_v25 = vld [vmem:[#allocation2 + $0xa8] sm:$0xff] }
  0x3f   :  { %461 = vmatprep.subr.bf16.mxu0 %v609_v0  ;;  %497 = vmatprep.subr.bf16.mxu1 %v609_v0  ;;  %v60_v27 = vld [vmem:[#allocation2 + $0xa0] sm:$0xff]  ;;  %v95_v30 = vld [vmem:[#allocation2 + $0x1b8] sm:$0xff]  ;;  %v62_v31 = vld [vmem:[#allocation2 + $0xb0] sm:$0xff] }
  0x40   :  { %v92_v28 = vld [vmem:[#allocation2 + $0x1a0] sm:$0xff]  ;;  %v65_v33 = vld [vmem:[#allocation2 + $0xc8] sm:$0xff]  ;;  %v67_v37 = vld [vmem:[#allocation2 + $0xd8] sm:$0xff] }
  0x41   :  { %v97_v34 = vld [vmem:[#allocation2 + $0x1c8] sm:$0xff]  ;;  %v96_v36 = vld [vmem:[#allocation2 + $0x1c0] sm:$0xff]  ;;  %v66_v39 = vld [vmem:[#allocation2 + $0xd0] sm:$0xff] }
  0x42   :  { %463 = vmatpush1.bf16.msra.mxu0 %v462_v23  ;;  %513 = vmatpush1.bf16.msra.mxu1 %v462_v23  ;;  %v58_v23 = vld [vmem:[#allocation2 + $0x90] sm:$0xff]  ;;  %v101_v42 = vld [vmem:[#allocation2 + $0x1e8] sm:$0xff]  ;;  %v68_v43 = vld [vmem:[#allocation2 + $0xe0] sm:$0xff] }
  0x43   :  { %464 = vmatprep.subr.bf16.mxu0 %v609_v0  ;;  %498 = vmatprep.subr.bf16.mxu1 %v609_v0  ;;  %v98_v40 = vld [vmem:[#allocation2 + $0x1d0] sm:$0xff]  ;;  %v71_v45 = vld [vmem:[#allocation2 + $0xf8] sm:$0xff] }
  0x44   :  { %v103_v46 = vld [vmem:[#allocation2 + $0x1f8] sm:$0xff]  ;;  %v102_v48 = vld [vmem:[#allocation2 + $0x1f0] sm:$0xff] }
  0x46   :  { %466 = vmatpush1.bf16.msra.mxu0 %v465_v26  ;;  %514 = vmatpush1.bf16.msra.mxu1 %v465_v26  ;;  %v93_v26 = vld [vmem:[#allocation2 + $0x1a8] sm:$0xff] }
  0x47   :  { %467 = vmatprep.subr.bf16.mxu0 %v609_v0  ;;  %499 = vmatprep.subr.bf16.mxu1 %v609_v0 }
  0x4a   :  { %469 = vmatpush1.bf16.msra.mxu0 %v468_v29  ;;  %515 = vmatpush1.bf16.msra.mxu1 %v468_v29  ;;  %v63_v29 = vld [vmem:[#allocation2 + $0xb8] sm:$0xff] }
  0x4b   :  { %470 = vmatprep.subr.bf16.mxu0 %v609_v0  ;;  %500 = vmatprep.subr.bf16.mxu1 %v609_v0 }
  0x4e   :  { %472 = vmatpush1.bf16.msra.mxu0 %v471_v32  ;;  %516 = vmatpush1.bf16.msra.mxu1 %v471_v32  ;;  %v94_v32 = vld [vmem:[#allocation2 + $0x1b0] sm:$0xff] }
  0x4f   :  { %473 = vmatprep.subr.bf16.mxu0 %v609_v0  ;;  %501 = vmatprep.subr.bf16.mxu1 %v609_v0 }
  0x52   :  { %475 = vmatpush1.bf16.msra.mxu0 %v474_v35  ;;  %517 = vmatpush1.bf16.msra.mxu1 %v474_v35  ;;  %v64_v35 = vld [vmem:[#allocation2 + $0xc0] sm:$0xff] }
  0x53   :  { %476 = vmatprep.subr.bf16.mxu0 %v609_v0  ;;  %502 = vmatprep.subr.bf16.mxu1 %v609_v0 }
  0x56   :  { %478 = vmatpush1.bf16.msra.mxu0 %v477_v38  ;;  %518 = vmatpush1.bf16.msra.mxu1 %v477_v38  ;;  %v99_v38 = vld [vmem:[#allocation2 + $0x1d8] sm:$0xff] }
  0x57   :  { %479 = vmatprep.subr.bf16.mxu0 %v609_v0  ;;  %503 = vmatprep.subr.bf16.mxu1 %v609_v0 }
  0x5a   :  { %481 = vmatpush1.bf16.msra.mxu0 %v480_v41  ;;  %519 = vmatpush1.bf16.msra.mxu1 %v480_v41  ;;  %v69_v41 = vld [vmem:[#allocation2 + $0xe8] sm:$0xff] }
  0x5b   :  { %482 = vmatprep.subr.bf16.mxu0 %v609_v0  ;;  %504 = vmatprep.subr.bf16.mxu1 %v609_v0 }
  0x5e   :  { %484 = vmatpush1.bf16.msra.mxu0 %v483_v44  ;;  %520 = vmatpush1.bf16.msra.mxu1 %v483_v44  ;;  %v100_v44 = vld [vmem:[#allocation2 + $0x1e0] sm:$0xff] }
  0x5f   :  { %485 = vmatprep.subr.bf16.mxu0 %v609_v0  ;;  %505 = vmatprep.subr.bf16.mxu1 %v609_v0 }
  0x62   :  { %487 = vmatpush1.bf16.msra.mxu0 %v486_v47  ;;  %521 = vmatpush1.bf16.msra.mxu1 %v486_v47  ;;  %v70_v47 = vld [vmem:[#allocation2 + $0xf0] sm:$0xff] }
  0x63   :  { %488 = vmatprep.subr.bf16.mxu0 %v609_v0  ;;  %506 = vmatprep.subr.bf16.mxu1 %v609_v0  ;;  %v78_v0 = vld [vmem:[#allocation2 + $0x130] sm:$0xff] }
  0x66   :  { %490 = vmatpush1.bf16.msra.mxu0 %v489_v50  ;;  %522 = vmatpush1.bf16.msra.mxu1 %v489_v50 }
  0x69   :  { %201 = vmatmul.mubr.f32.vlgmr.msra.gmra.mrb[0].mxu0 %v40_v51  ;;  %281 = vmatmul.mubr.f32.vlgmr.msra.gmra.mrb[0].mxu1 %v72_v52 }
  0x6a   :  { %205 = vmatprep.mubr.f32.mxu0 %v43_v53  ;;  %285 = vmatprep.mubr.f32.mxu1 %v75_v54 }
  0x6d   :  { %206 = vmatmul.mubr.f32.gmra.mrb[2].mxu0 %v42_v55  ;;  %286 = vmatmul.mubr.f32.gmra.mrb[2].mxu1 %v74_v56 }
  0x6e   :  { %210 = vmatprep.mubr.f32.mxu0 %v45_v57  ;;  %290 = vmatprep.mubr.f32.mxu1 %v77_v58 }
  0x71   :  { %211 = vmatmul.mubr.f32.gmra.mrb[4].mxu0 %v44_v59  ;;  %291 = vmatmul.mubr.f32.gmra.mrb[4].mxu1 %v76_v60 }
  0x72   :  { %215 = vmatprep.mubr.f32.mxu0 %v47_v61  ;;  %295 = vmatprep.mubr.f32.mxu1 %v79_v62 }
  0x75   :  { %216 = vmatmul.mubr.f32.gmra.mrb[6].mxu0 %v46_v63  ;;  %296 = vmatmul.mubr.f32.gmra.mrb[6].mxu1 %v78_v0 }
  0x76   :  { %220 = vmatprep.mubr.f32.mxu0 %v49_v1  ;;  %300 = vmatprep.mubr.f32.mxu1 %v81_v2 }
  0x79   :  { %221 = vmatmul.mubr.f32.gmra.mrb[8].mxu0 %v48_v3  ;;  %301 = vmatmul.mubr.f32.gmra.mrb[8].mxu1 %v80_v4 }
  0x7a   :  { %225 = vmatprep.mubr.f32.mxu0 %v51_v5  ;;  %305 = vmatprep.mubr.f32.mxu1 %v83_v6 }
  0x7d   :  { %226 = vmatmul.mubr.f32.gmra.mrb[10].mxu0 %v50_v7  ;;  %306 = vmatmul.mubr.f32.gmra.mrb[10].mxu1 %v82_v8 }
  0x7e   :  { %230 = vmatprep.mubr.f32.mxu0 %v53_v9  ;;  %310 = vmatprep.mubr.f32.mxu1 %v85_v10 }
  0x81   :  { %231 = vmatmul.mubr.f32.gmra.mrb[12].mxu0 %v52_v11  ;;  %311 = vmatmul.mubr.f32.gmra.mrb[12].mxu1 %v84_v12 }
  0x82   :  { %235 = vmatprep.mubr.f32.mxu0 %v55_v13  ;;  %315 = vmatprep.mubr.f32.mxu1 %v87_v14 }
  0x85   :  { %236 = vmatmul.mubr.f32.gmra.mrb[14].mxu0 %v54_v15  ;;  %316 = vmatmul.mubr.f32.gmra.mrb[14].mxu1 %v86_v16 }
  0x86   :  { %240 = vmatprep.mubr.f32.mxu0 %v57_v17  ;;  %320 = vmatprep.mubr.f32.mxu1 %v89_v18 }
  0x89   :  { %241 = vmatmul.mubr.f32.gmra.mrb[16].mxu0 %v56_v19  ;;  %321 = vmatmul.mubr.f32.gmra.mrb[16].mxu1 %v88_v20 }
  0x8a   :  { %245 = vmatprep.mubr.f32.mxu0 %v59_v21  ;;  %325 = vmatprep.mubr.f32.mxu1 %v91_v22 }
  0x8d   :  { %246 = vmatmul.mubr.f32.gmra.mrb[18].mxu0 %v58_v23  ;;  %326 = vmatmul.mubr.f32.gmra.mrb[18].mxu1 %v90_v24 }
  0x8e   :  { %250 = vmatprep.mubr.f32.mxu0 %v61_v25  ;;  %330 = vmatprep.mubr.f32.mxu1 %v93_v26 }
  0x91   :  { %251 = vmatmul.mubr.f32.gmra.mrb[20].mxu0 %v60_v27  ;;  %331 = vmatmul.mubr.f32.gmra.mrb[20].mxu1 %v92_v28 }
  0x92   :  { %255 = vmatprep.mubr.f32.mxu0 %v63_v29  ;;  %335 = vmatprep.mubr.f32.mxu1 %v95_v30 }
  0x95   :  { %256 = vmatmul.mubr.f32.gmra.mrb[22].mxu0 %v62_v31  ;;  %336 = vmatmul.mubr.f32.gmra.mrb[22].mxu1 %v94_v32 }
  0x96   :  { %260 = vmatprep.mubr.f32.mxu0 %v65_v33  ;;  %340 = vmatprep.mubr.f32.mxu1 %v97_v34 }
  0x99   :  { %261 = vmatmul.mubr.f32.gmra.mrb[24].mxu0 %v64_v35  ;;  %341 = vmatmul.mubr.f32.gmra.mrb[24].mxu1 %v96_v36 }
  0x9a   :  { %265 = vmatprep.mubr.f32.mxu0 %v67_v37  ;;  %345 = vmatprep.mubr.f32.mxu1 %v99_v38 }
  0x9d   :  { %266 = vmatmul.mubr.f32.gmra.mrb[26].mxu0 %v66_v39  ;;  %346 = vmatmul.mubr.f32.gmra.mrb[26].mxu1 %v98_v40 }
  0x9e   :  { %270 = vmatprep.mubr.f32.mxu0 %v69_v41  ;;  %350 = vmatprep.mubr.f32.mxu1 %v101_v42 }
  0xa1   :  { %271 = vmatmul.mubr.f32.gmra.mrb[28].mxu0 %v68_v43  ;;  %351 = vmatmul.mubr.f32.gmra.mrb[28].mxu1 %v100_v44 }
  0xa2   :  { %275 = vmatprep.mubr.f32.mxu0 %v71_v45  ;;  %355 = vmatprep.mubr.f32.mxu1 %v103_v46 }
  0xa5   :  { %276 = vmatmul.mubr.f32.gmra.mrb[30].mxu0 %v70_v47  ;;  %356 = vmatmul.mubr.f32.gmra.mrb[30].mxu1 %v102_v48 }
 0x13c   :  { %v202_v49 = vpop.f32.mrb[0].mxu0  ;;  %v282_v50 = vpop.f32.mrb[0].mxu1 }
 0x13d   :  { %v361_v51 = vmax.f32 %v202_v49, 0.0  ;;  %v377_v52 = vmax.f32 %v282_v50, 0.0  ;;  %v204_v53 = vpop.f32.mrb[1].mxu0  ;;  %v284_v54 = vpop.f32.mrb[1].mxu1 }
 0x13f   :  { %393 = vst [vmem:[#allocation7] sm:$0xff] %v361_v51  ;;  %409 = vst [vmem:[#allocation7 + $0x80] sm:$0xff] %v377_v52 }
 0x140   :  { %v207_v55 = vpop.f32.mrb[2].mxu0  ;;  %v287_v56 = vpop.f32.mrb[2].mxu1 }
 0x141   :  { %v362_v57 = vmax.f32 %v207_v55, 0.0  ;;  %v378_v58 = vmax.f32 %v287_v56, 0.0  ;;  %v209_v59 = vpop.f32.mrb[3].mxu0  ;;  %v289_v60 = vpop.f32.mrb[3].mxu1 }
 0x143   :  { %394 = vst [vmem:[#allocation7 + $0x8] sm:$0xff] %v362_v57  ;;  %410 = vst [vmem:[#allocation7 + $0x88] sm:$0xff] %v378_v58 }
 0x144   :  { %v212_v61 = vpop.f32.mrb[4].mxu0  ;;  %v292_v62 = vpop.f32.mrb[4].mxu1 }
 0x145   :  { %v363_v63 = vmax.f32 %v212_v61, 0.0  ;;  %v379_v0 = vmax.f32 %v292_v62, 0.0  ;;  %v214_v1 = vpop.f32.mrb[5].mxu0  ;;  %v294_v2 = vpop.f32.mrb[5].mxu1 }
 0x147   :  { %395 = vst [vmem:[#allocation7 + $0x10] sm:$0xff] %v363_v63  ;;  %411 = vst [vmem:[#allocation7 + $0x90] sm:$0xff] %v379_v0 }
 0x148   :  { %v217_v3 = vpop.f32.mrb[6].mxu0  ;;  %v297_v4 = vpop.f32.mrb[6].mxu1 }
 0x149   :  { %v364_v5 = vmax.f32 %v217_v3, 0.0  ;;  %v380_v6 = vmax.f32 %v297_v4, 0.0  ;;  %v219_v7 = vpop.f32.mrb[7].mxu0  ;;  %v299_v8 = vpop.f32.mrb[7].mxu1 }
 0x14b   :  { %396 = vst [vmem:[#allocation7 + $0x18] sm:$0xff] %v364_v5  ;;  %412 = vst [vmem:[#allocation7 + $0x98] sm:$0xff] %v380_v6 }
 0x14c   :  { %v222_v9 = vpop.f32.mrb[8].mxu0  ;;  %v302_v10 = vpop.f32.mrb[8].mxu1 }
 0x14d   :  { %v365_v11 = vmax.f32 %v222_v9, 0.0  ;;  %v381_v12 = vmax.f32 %v302_v10, 0.0  ;;  %v224_v13 = vpop.f32.mrb[9].mxu0  ;;  %v304_v14 = vpop.f32.mrb[9].mxu1 }
 0x14f   :  { %397 = vst [vmem:[#allocation7 + $0x20] sm:$0xff] %v365_v11  ;;  %413 = vst [vmem:[#allocation7 + $0xa0] sm:$0xff] %v381_v12 }
 0x150   :  { %v227_v15 = vpop.f32.mrb[10].mxu0  ;;  %v307_v16 = vpop.f32.mrb[10].mxu1 }
 0x151   :  { %v366_v17 = vmax.f32 %v227_v15, 0.0  ;;  %v382_v18 = vmax.f32 %v307_v16, 0.0  ;;  %v229_v19 = vpop.f32.mrb[11].mxu0  ;;  %v309_v20 = vpop.f32.mrb[11].mxu1 }
 0x153   :  { %398 = vst [vmem:[#allocation7 + $0x28] sm:$0xff] %v366_v17  ;;  %414 = vst [vmem:[#allocation7 + $0xa8] sm:$0xff] %v382_v18 }
 0x154   :  { %v232_v21 = vpop.f32.mrb[12].mxu0  ;;  %v312_v22 = vpop.f32.mrb[12].mxu1 }
 0x155   :  { %v367_v23 = vmax.f32 %v232_v21, 0.0  ;;  %v383_v24 = vmax.f32 %v312_v22, 0.0  ;;  %v234_v25 = vpop.f32.mrb[13].mxu0  ;;  %v314_v26 = vpop.f32.mrb[13].mxu1 }
 0x157   :  { %399 = vst [vmem:[#allocation7 + $0x30] sm:$0xff] %v367_v23  ;;  %415 = vst [vmem:[#allocation7 + $0xb0] sm:$0xff] %v383_v24 }
 0x158   :  { %v237_v27 = vpop.f32.mrb[14].mxu0  ;;  %v317_v28 = vpop.f32.mrb[14].mxu1 }
 0x159   :  { %v368_v29 = vmax.f32 %v237_v27, 0.0  ;;  %v384_v30 = vmax.f32 %v317_v28, 0.0  ;;  %v239_v31 = vpop.f32.mrb[15].mxu0  ;;  %v319_v32 = vpop.f32.mrb[15].mxu1 }
 0x15b   :  { %400 = vst [vmem:[#allocation7 + $0x38] sm:$0xff] %v368_v29  ;;  %416 = vst [vmem:[#allocation7 + $0xb8] sm:$0xff] %v384_v30 }
 0x15c   :  { %v242_v33 = vpop.f32.mrb[16].mxu0  ;;  %v322_v34 = vpop.f32.mrb[16].mxu1 }
 0x15d   :  { %v369_v35 = vmax.f32 %v242_v33, 0.0  ;;  %v385_v36 = vmax.f32 %v322_v34, 0.0  ;;  %v244_v37 = vpop.f32.mrb[17].mxu0  ;;  %v324_v38 = vpop.f32.mrb[17].mxu1 }
 0x15f   :  { %401 = vst [vmem:[#allocation7 + $0x40] sm:$0xff] %v369_v35  ;;  %417 = vst [vmem:[#allocation7 + $0xc0] sm:$0xff] %v385_v36 }
 0x160   :  { %v247_v39 = vpop.f32.mrb[18].mxu0  ;;  %v327_v40 = vpop.f32.mrb[18].mxu1 }
 0x161   :  { %v370_v41 = vmax.f32 %v247_v39, 0.0  ;;  %v386_v42 = vmax.f32 %v327_v40, 0.0  ;;  %v249_v43 = vpop.f32.mrb[19].mxu0  ;;  %v329_v44 = vpop.f32.mrb[19].mxu1 }
 0x163   :  { %402 = vst [vmem:[#allocation7 + $0x48] sm:$0xff] %v370_v41  ;;  %418 = vst [vmem:[#allocation7 + $0xc8] sm:$0xff] %v386_v42 }
 0x164   :  { %v252_v45 = vpop.f32.mrb[20].mxu0  ;;  %v332_v46 = vpop.f32.mrb[20].mxu1 }
 0x165   :  { %v371_v47 = vmax.f32 %v252_v45, 0.0  ;;  %v387_v48 = vmax.f32 %v332_v46, 0.0  ;;  %v254_v49 = vpop.f32.mrb[21].mxu0  ;;  %v334_v50 = vpop.f32.mrb[21].mxu1 }
 0x167   :  { %403 = vst [vmem:[#allocation7 + $0x50] sm:$0xff] %v371_v47  ;;  %419 = vst [vmem:[#allocation7 + $0xd0] sm:$0xff] %v387_v48 }
 0x168   :  { %v257_v51 = vpop.f32.mrb[22].mxu0  ;;  %v337_v52 = vpop.f32.mrb[22].mxu1 }
 0x169   :  { %v372_v53 = vmax.f32 %v257_v51, 0.0  ;;  %v388_v54 = vmax.f32 %v337_v52, 0.0  ;;  %v259_v55 = vpop.f32.mrb[23].mxu0  ;;  %v339_v56 = vpop.f32.mrb[23].mxu1 }
 0x16b   :  { %404 = vst [vmem:[#allocation7 + $0x58] sm:$0xff] %v372_v53  ;;  %420 = vst [vmem:[#allocation7 + $0xd8] sm:$0xff] %v388_v54 }
 0x16c   :  { %v262_v57 = vpop.f32.mrb[24].mxu0  ;;  %v342_v58 = vpop.f32.mrb[24].mxu1 }
 0x16d   :  { %v373_v59 = vmax.f32 %v262_v57, 0.0  ;;  %v389_v60 = vmax.f32 %v342_v58, 0.0  ;;  %v264_v61 = vpop.f32.mrb[25].mxu0  ;;  %v344_v62 = vpop.f32.mrb[25].mxu1 }
 0x16f   :  { %405 = vst [vmem:[#allocation7 + $0x60] sm:$0xff] %v373_v59  ;;  %421 = vst [vmem:[#allocation7 + $0xe0] sm:$0xff] %v389_v60 }
 0x170   :  { %v267_v63 = vpop.f32.mrb[26].mxu0  ;;  %v347_v0 = vpop.f32.mrb[26].mxu1 }
 0x171   :  { %v374_v1 = vmax.f32 %v267_v63, 0.0  ;;  %v390_v2 = vmax.f32 %v347_v0, 0.0  ;;  %v269_v3 = vpop.f32.mrb[27].mxu0  ;;  %v349_v4 = vpop.f32.mrb[27].mxu1 }
 0x173   :  { %406 = vst [vmem:[#allocation7 + $0x68] sm:$0xff] %v374_v1  ;;  %422 = vst [vmem:[#allocation7 + $0xe8] sm:$0xff] %v390_v2 }
 0x174   :  { %v272_v5 = vpop.f32.mrb[28].mxu0  ;;  %v352_v6 = vpop.f32.mrb[28].mxu1 }
 0x175   :  { %v375_v7 = vmax.f32 %v272_v5, 0.0  ;;  %v391_v8 = vmax.f32 %v352_v6, 0.0  ;;  %v274_v9 = vpop.f32.mrb[29].mxu0  ;;  %v354_v10 = vpop.f32.mrb[29].mxu1 }
 0x177   :  { %407 = vst [vmem:[#allocation7 + $0x70] sm:$0xff] %v375_v7  ;;  %423 = vst [vmem:[#allocation7 + $0xf0] sm:$0xff] %v391_v8 }
 0x178   :  { %v277_v11 = vpop.f32.mrb[30].mxu0  ;;  %v357_v12 = vpop.f32.mrb[30].mxu1 }
 0x179   :  { %v376_v13 = vmax.f32 %v277_v11, 0.0  ;;  %v392_v14 = vmax.f32 %v357_v12, 0.0  ;;  %v279_v15 = vpop.f32.mrb[31].mxu0  ;;  %v359_v16 = vpop.f32.mrb[31].mxu1 }
 0x17b   :  { %408 = vst [vmem:[#allocation7 + $0x78] sm:$0xff] %v376_v13  ;;  %424 = vst [vmem:[#allocation7 + $0xf8] sm:$0xff] %v392_v14 }
 0x17c   :  { %586 = shalt.err (!%p583_p6)
}
 0x17d   :  { %s587_s12 = scalar_lea.hbm %s702_s2, 4096 }
 0x17e   :  { %p588_p7 = scmp.ne.s32.totalorder %s702_s2, %s587_s12  ;;  %p591_p8 = scmp.lt.u32.totalorder %s587_s12, %s702_s2 }
 0x180   :  { %p593_p9 = pnand %p591_p8, %p588_p7 }
 0x182   :  { %596 = shalt.err (!%p593_p9)
}
 0x183   :  { %436 = dma.vmem_to_hbm [thread:$0]  %s431_s8, 4096, %s702_s2, [#allocation4], %s607_s0, %s607_s0, %s608_s5  }
 0x184   :  { %601 = dma.done.wait [#allocation4], 4096  }
 0x185   :  { %602 = vsyncadd [#allocation4], 4294963200 }
 0x186   :  { %440 = vsyncpa [#allocation3], 1 }
 0x187   :  { %441 = vsyncpa [#allocation6], 1 }
 0x188   :  { %442 = vsyncpa [#allocation4], 1 }

// kernel: tpu_custom_call.1
= control target key start
LH: loop header
LB: loop body
LE: loop exit
PB: predicated region body
PF: predicated region fallthrough
CT: control target
= control target key end

     0   :  { %7 = vsyncpa [#allocation3], 0  ;;  %s700_s0 = inlined_call_operand.hbm [shape: f32[256,256], index: 0, kind: input, shape index: {}]   ;;  %s701_s1 = inlined_call_operand.hbm [shape: f32[256,128], index: 1, kind: input, shape index: {}]   ;;  %s702_s2 = inlined_call_operand.hbm [shape: f32[256,128], index: 2, kind: output, shape index: {}]  }
   0x1   :  { %8 = vsyncpa [#allocation6], 0 }
   0x2   :  { %9 = vsyncpa [#allocation4], 0  ;;  %s603_s9 = smov [#allocation2]   ;;  %s531_s13 = scalar_lea.hbm %s700_s0, 8192 }
   0x3   :  { %s15_s10 = sshll.u32 %s603_s9, 4  ;;  %p532_p0 = scmp.ne.s32.totalorder %s700_s0, %s531_s13  ;;  %s16_s10 = int_to_ptr.vmem [resolvable:$true] %s15_s10 }
   0x4   :  { %p535_p1 = scmp.lt.u32.totalorder %s531_s13, %s700_s0 }
   0x6   :  { %p537_p2 = pnand %p535_p1, %p532_p0 }
   0x8   :  { %540 = shalt.err (!%p537_p2)
}
   0x9   :  { %s541_s18 = scalar_lea.vmem %s16_s10, 8192  ;;  %p546_p4 = scmp.lt.s32.totalorder %s16_s10, %s16_s10 }
   0xa   :  { %p542_p3 = scmp.ne.s32.totalorder %s16_s10, %s541_s18  ;;  %p547_p5 = scmp.lt.s32.totalorder %s541_s18, %s541_s18 }
   0xc   :  { %p548_p6 = por %p547_p5, %p546_p4 }
   0xe   :  { %p549_p7 = pnand %p548_p6, %p542_p3 }
  0x10   :  { %552 = shalt.err (!%p549_p7)
}
  0x11   :  { %s604_s19 = smov 256   ;;  %s605_s20 = smov 16  }
  0x12   :  { %21 = dma.hbm_to_vmem [thread:$0]  %s700_s0, 8192, %s16_s10, [#allocation3], %s604_s19, %s604_s19, %s605_s20  }
  0x13   :  { %s606_s23 = smov [#allocation5]   ;;  %s553_s27 = scalar_lea.hbm %s701_s1, 4096 }
  0x14   :  { %s27_s24 = sshll.u32 %s606_s23, 4  ;;  %p554_p8 = scmp.ne.s32.totalorder %s701_s1, %s553_s27  ;;  %s28_s24 = int_to_ptr.vmem [resolvable:$true] %s27_s24 }
  0x15   :  { %p557_p9 = scmp.lt.u32.totalorder %s553_s27, %s701_s1 }
  0x17   :  { %p559_p10 = pnand %p557_p9, %p554_p8 }
  0x19   :  { %562 = shalt.err (!%p559_p10)
}
  0x1a   :  { %s563_s4 = scalar_lea.vmem %s28_s24, 4096  ;;  %p568_p12 = scmp.lt.s32.totalorder %s28_s24, %s28_s24 }
  0x1b   :  { %p564_p11 = scmp.ne.s32.totalorder %s28_s24, %s563_s4  ;;  %p569_p13 = scmp.lt.s32.totalorder %s563_s4, %s563_s4 }
  0x1d   :  { %p570_p0 = por %p569_p13, %p568_p12 }
  0x1f   :  { %p571_p1 = pnand %p570_p0, %p564_p11 }
  0x21   :  { %574 = shalt.err (!%p571_p1)
}
  0x22   :  { %s607_s0 = smov 128   ;;  %s608_s5 = smov 8  }
  0x23   :  { %33 = dma.hbm_to_vmem [thread:$0]  %s701_s1, 4096, %s28_s24, [#allocation6], %s607_s0, %s607_s0, %s608_s5  }
  0x24   :  { %597 = dma.done.wait [#allocation3], 8192  }
  0x25   :  { %598 = vsyncadd [#allocation3], 4294959104 }
  0x26   :  { %599 = dma.done.wait [#allocation6], 4096  }
  0x27   :  { %600 = vsyncadd [#allocation6], 4294963200  ;;  %v609_v0 = vmov 0.0|0.0   ;;  %v104_v1 = vld [vmem:[#allocation5] sm:$0xff]  ;;  %v105_v2 = vld [vmem:[#allocation5 + $0x8] sm:$0xff]  ;;  %s610_s1 = smov [#allocation7]  }
  0x28   :  { %443 = vmatprep.subr.bf16.mxu0 %v609_v0  ;;  %491 = vmatprep.subr.bf16.mxu1 %v609_v0  ;;  %v106_v3 = vld [vmem:[#allocation5 + $0x10] sm:$0xff]  ;;  %v444_v4 = vpack.c.bf16 %v105_v2, %v104_v1  ;;  %v107_v5 = vld [vmem:[#allocation5 + $0x18] sm:$0xff]  ;;  %v108_v7 = vld [vmem:[#allocation5 + $0x20] sm:$0xff]  ;;  %s430_s8 = sshll.u32 %s610_s1, 4  ;;  %s431_s8 = int_to_ptr.vmem [resolvable:$true] %s430_s8 }
  0x29   :  { %v447_v6 = vpack.c.bf16 %v107_v5, %v106_v3  ;;  %v109_v8 = vld [vmem:[#allocation5 + $0x28] sm:$0xff]  ;;  %v110_v10 = vld [vmem:[#allocation5 + $0x30] sm:$0xff]  ;;  %v111_v11 = vld [vmem:[#allocation5 + $0x38] sm:$0xff]  ;;  %s575_s9 = scalar_lea.vmem %s431_s8, 4096  ;;  %p580_p3 = scmp.lt.s32.totalorder %s431_s8, %s431_s8 }
  0x2a   :  { %445 = vmatpush1.bf16.msra.mxu0 %v444_v4  ;;  %507 = vmatpush1.bf16.msra.mxu1 %v444_v4  ;;  %v450_v9 = vpack.c.bf16 %v109_v8, %v108_v7  ;;  %v41_v12 = vld [vmem:[#allocation2 + $0x8] sm:$0xff]  ;;  %v453_v13 = vpack.c.bf16 %v111_v11, %v110_v10  ;;  %v112_v15 = vld [vmem:[#allocation5 + $0x40] sm:$0xff]  ;;  %v114_v18 = vld [vmem:[#allocation5 + $0x50] sm:$0xff]  ;;  %p576_p2 = scmp.ne.s32.totalorder %s431_s8, %s575_s9  ;;  %p581_p4 = scmp.lt.s32.totalorder %s575_s9, %s575_s9 }
  0x2b   :  { %446 = vmatprep.subr.bf16.mxu0 %v609_v0  ;;  %492 = vmatprep.subr.bf16.mxu1 %v609_v0  ;;  %v73_v14 = vld [vmem:[#allocation2 + $0x108] sm:$0xff]  ;;  %v115_v19 = vld [vmem:[#allocation5 + $0x58] sm:$0xff]  ;;  %v116_v21 = vld [vmem:[#allocation5 + $0x60] sm:$0xff] }
  0x2c   :  { %v113_v16 = vld [vmem:[#allocation5 + $0x48] sm:$0xff]  ;;  %200 = vmatprep.mubr.f32.mxu0 %v41_v12  ;;  %280 = vmatprep.mubr.f32.mxu1 %v73_v14  ;;  %v459_v20 = vpack.c.bf16 %v115_v19, %v114_v18  ;;  %v118_v24 = vld [vmem:[#allocation5 + $0x70] sm:$0xff]  ;;  %v119_v25 = vld [vmem:[#allocation5 + $0x78] sm:$0xff]  ;;  %p582_p5 = por %p581_p4, %p580_p3 }
  0x2d   :  { %v456_v17 = vpack.c.bf16 %v113_v16, %v112_v15  ;;  %v117_v22 = vld [vmem:[#allocation5 + $0x68] sm:$0xff]  ;;  %v465_v26 = vpack.c.bf16 %v119_v25, %v118_v24  ;;  %v120_v27 = vld [vmem:[#allocation5 + $0x80] sm:$0xff]  ;;  %v122_v30 = vld [vmem:[#allocation5 + $0x90] sm:$0xff] }
  0x2e   :  { %448 = vmatpush1.bf16.msra.mxu0 %v447_v6  ;;  %508 = vmatpush1.bf16.msra.mxu1 %v447_v6  ;;  %v462_v23 = vpack.c.bf16 %v117_v22, %v116_v21  ;;  %v121_v28 = vld [vmem:[#allocation5 + $0x88] sm:$0xff]  ;;  %v123_v31 = vld [vmem:[#allocation5 + $0x98] sm:$0xff]  ;;  %v124_v33 = vld [vmem:[#allocation5 + $0xa0] sm:$0xff]  ;;  %p583_p6 = pnand %p582_p5, %p576_p2 }
  0x2f   :  { %449 = vmatprep.subr.bf16.mxu0 %v609_v0  ;;  %493 = vmatprep.subr.bf16.mxu1 %v609_v0  ;;  %v468_v29 = vpack.c.bf16 %v121_v28, %v120_v27  ;;  %v471_v32 = vpack.c.bf16 %v123_v31, %v122_v30  ;;  %v125_v34 = vld [vmem:[#allocation5 + $0xa8] sm:$0xff]  ;;  %v126_v36 = vld [vmem:[#allocation5 + $0xb0] sm:$0xff]  ;;  %v127_v37 = vld [vmem:[#allocation5 + $0xb8] sm:$0xff] }
  0x30   :  { %v474_v35 = vpack.c.bf16 %v125_v34, %v124_v33  ;;  %v477_v38 = vpack.c.bf16 %v127_v37, %v126_v36  ;;  %v128_v39 = vld [vmem:[#allocation5 + $0xc0] sm:$0xff]  ;;  %v129_v40 = vld [vmem:[#allocation5 + $0xc8] sm:$0xff]  ;;  %v130_v42 = vld [vmem:[#allocation5 + $0xd0] sm:$0xff] }
  0x31   :  { %v480_v41 = vpack.c.bf16 %v129_v40, %v128_v39  ;;  %v131_v43 = vld [vmem:[#allocation5 + $0xd8] sm:$0xff]  ;;  %v132_v45 = vld [vmem:[#allocation5 + $0xe0] sm:$0xff]  ;;  %v133_v46 = vld [vmem:[#allocation5 + $0xe8] sm:$0xff] }
  0x32   :  { %451 = vmatpush1.bf16.msra.mxu0 %v450_v9  ;;  %509 = vmatpush1.bf16.msra.mxu1 %v450_v9  ;;  %v483_v44 = vpack.c.bf16 %v131_v43, %v130_v42  ;;  %v486_v47 = vpack.c.bf16 %v133_v46, %v132_v45  ;;  %v134_v48 = vld [vmem:[#allocation5 + $0xf0] sm:$0xff]  ;;  %v135_v49 = vld [vmem:[#allocation5 + $0xf8] sm:$0xff]  ;;  %v40_v51 = vld [vmem:[#allocation2] sm:$0xff] }
  0x33   :  { %452 = vmatprep.subr.bf16.mxu0 %v609_v0  ;;  %494 = vmatprep.subr.bf16.mxu1 %v609_v0  ;;  %v489_v50 = vpack.c.bf16 %v135_v49, %v134_v48  ;;  %v72_v52 = vld [vmem:[#allocation2 + $0x100] sm:$0xff]  ;;  %v43_v53 = vld [vmem:[#allocation2 + $0x18] sm:$0xff]  ;;  %v42_v55 = vld [vmem:[#allocation2 + $0x10] sm:$0xff] }
  0x34   :  { %v75_v54 = vld [vmem:[#allocation2 + $0x118] sm:$0xff]  ;;  %v74_v56 = vld [vmem:[#allocation2 + $0x110] sm:$0xff]  ;;  %v45_v57 = vld [vmem:[#allocation2 + $0x28] sm:$0xff] }
  0x35   :  { %v77_v58 = vld [vmem:[#allocation2 + $0x128] sm:$0xff]  ;;  %v44_v59 = vld [vmem:[#allocation2 + $0x20] sm:$0xff]  ;;  %v47_v61 = vld [vmem:[#allocation2 + $0x38] sm:$0xff] }
  0x36   :  { %454 = vmatpush1.bf16.msra.mxu0 %v453_v13  ;;  %510 = vmatpush1.bf16.msra.mxu1 %v453_v13  ;;  %v76_v60 = vld [vmem:[#allocation2 + $0x120] sm:$0xff]  ;;  %v79_v62 = vld [vmem:[#allocation2 + $0x138] sm:$0xff]  ;;  %v46_v63 = vld [vmem:[#allocation2 + $0x30] sm:$0xff] }
  0x37   :  { %455 = vmatprep.subr.bf16.mxu0 %v609_v0  ;;  %495 = vmatprep.subr.bf16.mxu1 %v609_v0  ;;  %v49_v1 = vld [vmem:[#allocation2 + $0x48] sm:$0xff]  ;;  %v48_v3 = vld [vmem:[#allocation2 + $0x40] sm:$0xff]  ;;  %v51_v5 = vld [vmem:[#allocation2 + $0x58] sm:$0xff] }
  0x38   :  { %v81_v2 = vld [vmem:[#allocation2 + $0x148] sm:$0xff]  ;;  %v80_v4 = vld [vmem:[#allocation2 + $0x140] sm:$0xff]  ;;  %v83_v6 = vld [vmem:[#allocation2 + $0x158] sm:$0xff] }
  0x39   :  { %v50_v7 = vld [vmem:[#allocation2 + $0x50] sm:$0xff]  ;;  %v53_v9 = vld [vmem:[#allocation2 + $0x68] sm:$0xff]  ;;  %v52_v11 = vld [vmem:[#allocation2 + $0x60] sm:$0xff] }
  0x3a   :  { %457 = vmatpush1.bf16.msra.mxu0 %v456_v17  ;;  %511 = vmatpush1.bf16.msra.mxu1 %v456_v17  ;;  %v82_v8 = vld [vmem:[#allocation2 + $0x150] sm:$0xff]  ;;  %v85_v10 = vld [vmem:[#allocation2 + $0x168] sm:$0xff]  ;;  %v84_v12 = vld [vmem:[#allocation2 + $0x160] sm:$0xff] }
  0x3b   :  { %458 = vmatprep.subr.bf16.mxu0 %v609_v0  ;;  %496 = vmatprep.subr.bf16.mxu1 %v609_v0  ;;  %v55_v13 = vld [vmem:[#allocation2 + $0x78] sm:$0xff]  ;;  %v54_v15 = vld [vmem:[#allocation2 + $0x70] sm:$0xff]  ;;  %v57_v17 = vld [vmem:[#allocation2 + $0x88] sm:$0xff] }
  0x3c   :  { %v87_v14 = vld [vmem:[#allocation2 + $0x178] sm:$0xff]  ;;  %v86_v16 = vld [vmem:[#allocation2 + $0x170] sm:$0xff]  ;;  %v89_v18 = vld [vmem:[#allocation2 + $0x188] sm:$0xff] }
  0x3d   :  { %v56_v19 = vld [vmem:[#allocation2 + $0x80] sm:$0xff]  ;;  %v59_v21 = vld [vmem:[#allocation2 + $0x98] sm:$0xff]  ;;  %v90_v24 = vld [vmem:[#allocation2 + $0x190] sm:$0xff] }
  0x3e   :  { %460 = vmatpush1.bf16.msra.mxu0 %v459_v20  ;;  %512 = vmatpush1.bf16.msra.mxu1 %v459_v20  ;;  %v88_v20 = vld [vmem:[#allocation2 + $0x180] sm:$0xff]  ;;  %v91_v22 = vld [vmem:[#allocation2 + $0x198] sm:$0xff]  ;;  %v61_v25 = vld [vmem:[#allocation2 + $0xa8] sm:$0xff] }
  0x3f   :  { %461 = vmatprep.subr.bf16.mxu0 %v609_v0  ;;  %497 = vmatprep.subr.bf16.mxu1 %v609_v0  ;;  %v60_v27 = vld [vmem:[#allocation2 + $0xa0] sm:$0xff]  ;;  %v95_v30 = vld [vmem:[#allocation2 + $0x1b8] sm:$0xff]  ;;  %v62_v31 = vld [vmem:[#allocation2 + $0xb0] sm:$0xff] }
  0x40   :  { %v92_v28 = vld [vmem:[#allocation2 + $0x1a0] sm:$0xff]  ;;  %v65_v33 = vld [vmem:[#allocation2 + $0xc8] sm:$0xff]  ;;  %v67_v37 = vld [vmem:[#allocation2 + $0xd8] sm:$0xff] }
  0x41   :  { %v97_v34 = vld [vmem:[#allocation2 + $0x1c8] sm:$0xff]  ;;  %v96_v36 = vld [vmem:[#allocation2 + $0x1c0] sm:$0xff]  ;;  %v66_v39 = vld [vmem:[#allocation2 + $0xd0] sm:$0xff] }
  0x42   :  { %463 = vmatpush1.bf16.msra.mxu0 %v462_v23  ;;  %513 = vmatpush1.bf16.msra.mxu1 %v462_v23  ;;  %v58_v23 = vld [vmem:[#allocation2 + $0x90] sm:$0xff]  ;;  %v101_v42 = vld [vmem:[#allocation2 + $0x1e8] sm:$0xff]  ;;  %v68_v43 = vld [vmem:[#allocation2 + $0xe0] sm:$0xff] }
  0x43   :  { %464 = vmatprep.subr.bf16.mxu0 %v609_v0  ;;  %498 = vmatprep.subr.bf16.mxu1 %v609_v0  ;;  %v98_v40 = vld [vmem:[#allocation2 + $0x1d0] sm:$0xff]  ;;  %v71_v45 = vld [vmem:[#allocation2 + $0xf8] sm:$0xff] }
  0x44   :  { %v103_v46 = vld [vmem:[#allocation2 + $0x1f8] sm:$0xff]  ;;  %v102_v48 = vld [vmem:[#allocation2 + $0x1f0] sm:$0xff] }
  0x46   :  { %466 = vmatpush1.bf16.msra.mxu0 %v465_v26  ;;  %514 = vmatpush1.bf16.msra.mxu1 %v465_v26  ;;  %v93_v26 = vld [vmem:[#allocation2 + $0x1a8] sm:$0xff] }
  0x47   :  { %467 = vmatprep.subr.bf16.mxu0 %v609_v0  ;;  %499 = vmatprep.subr.bf16.mxu1 %v609_v0 }
  0x4a   :  { %469 = vmatpush1.bf16.msra.mxu0 %v468_v29  ;;  %515 = vmatpush1.bf16.msra.mxu1 %v468_v29  ;;  %v63_v29 = vld [vmem:[#allocation2 + $0xb8] sm:$0xff] }
  0x4b   :  { %470 = vmatprep.subr.bf16.mxu0 %v609_v0  ;;  %500 = vmatprep.subr.bf16.mxu1 %v609_v0 }
  0x4e   :  { %472 = vmatpush1.bf16.msra.mxu0 %v471_v32  ;;  %516 = vmatpush1.bf16.msra.mxu1 %v471_v32  ;;  %v94_v32 = vld [vmem:[#allocation2 + $0x1b0] sm:$0xff] }
  0x4f   :  { %473 = vmatprep.subr.bf16.mxu0 %v609_v0  ;;  %501 = vmatprep.subr.bf16.mxu1 %v609_v0 }
  0x52   :  { %475 = vmatpush1.bf16.msra.mxu0 %v474_v35  ;;  %517 = vmatpush1.bf16.msra.mxu1 %v474_v35  ;;  %v64_v35 = vld [vmem:[#allocation2 + $0xc0] sm:$0xff] }
  0x53   :  { %476 = vmatprep.subr.bf16.mxu0 %v609_v0  ;;  %502 = vmatprep.subr.bf16.mxu1 %v609_v0 }
  0x56   :  { %478 = vmatpush1.bf16.msra.mxu0 %v477_v38  ;;  %518 = vmatpush1.bf16.msra.mxu1 %v477_v38  ;;  %v99_v38 = vld [vmem:[#allocation2 + $0x1d8] sm:$0xff] }
  0x57   :  { %479 = vmatprep.subr.bf16.mxu0 %v609_v0  ;;  %503 = vmatprep.subr.bf16.mxu1 %v609_v0 }
  0x5a   :  { %481 = vmatpush1.bf16.msra.mxu0 %v480_v41  ;;  %519 = vmatpush1.bf16.msra.mxu1 %v480_v41  ;;  %v69_v41 = vld [vmem:[#allocation2 + $0xe8] sm:$0xff] }
  0x5b   :  { %482 = vmatprep.subr.bf16.mxu0 %v609_v0  ;;  %504 = vmatprep.subr.bf16.mxu1 %v609_v0 }
  0x5e   :  { %484 = vmatpush1.bf16.msra.mxu0 %v483_v44  ;;  %520 = vmatpush1.bf16.msra.mxu1 %v483_v44  ;;  %v100_v44 = vld [vmem:[#allocation2 + $0x1e0] sm:$0xff] }
  0x5f   :  { %485 = vmatprep.subr.bf16.mxu0 %v609_v0  ;;  %505 = vmatprep.subr.bf16.mxu1 %v609_v0 }
  0x62   :  { %487 = vmatpush1.bf16.msra.mxu0 %v486_v47  ;;  %521 = vmatpush1.bf16.msra.mxu1 %v486_v47  ;;  %v70_v47 = vld [vmem:[#allocation2 + $0xf0] sm:$0xff] }
  0x63   :  { %488 = vmatprep.subr.bf16.mxu0 %v609_v0  ;;  %506 = vmatprep.subr.bf16.mxu1 %v609_v0  ;;  %v78_v0 = vld [vmem:[#allocation2 + $0x130] sm:$0xff] }
  0x66   :  { %490 = vmatpush1.bf16.msra.mxu0 %v489_v50  ;;  %522 = vmatpush1.bf16.msra.mxu1 %v489_v50 }
  0x69   :  { %201 = vmatmul.mubr.f32.vlgmr.msra.gmra.mrb[0].mxu0 %v40_v51  ;;  %281 = vmatmul.mubr.f32.vlgmr.msra.gmra.mrb[0].mxu1 %v72_v52 }
  0x6a   :  { %205 = vmatprep.mubr.f32.mxu0 %v43_v53  ;;  %285 = vmatprep.mubr.f32.mxu1 %v75_v54 }
  0x6d   :  { %206 = vmatmul.mubr.f32.gmra.mrb[2].mxu0 %v42_v55  ;;  %286 = vmatmul.mubr.f32.gmra.mrb[2].mxu1 %v74_v56 }
  0x6e   :  { %210 = vmatprep.mubr.f32.mxu0 %v45_v57  ;;  %290 = vmatprep.mubr.f32.mxu1 %v77_v58 }
  0x71   :  { %211 = vmatmul.mubr.f32.gmra.mrb[4].mxu0 %v44_v59  ;;  %291 = vmatmul.mubr.f32.gmra.mrb[4].mxu1 %v76_v60 }
  0x72   :  { %215 = vmatprep.mubr.f32.mxu0 %v47_v61  ;;  %295 = vmatprep.mubr.f32.mxu1 %v79_v62 }
  0x75   :  { %216 = vmatmul.mubr.f32.gmra.mrb[6].mxu0 %v46_v63  ;;  %296 = vmatmul.mubr.f32.gmra.mrb[6].mxu1 %v78_v0 }
  0x76   :  { %220 = vmatprep.mubr.f32.mxu0 %v49_v1  ;;  %300 = vmatprep.mubr.f32.mxu1 %v81_v2 }
  0x79   :  { %221 = vmatmul.mubr.f32.gmra.mrb[8].mxu0 %v48_v3  ;;  %301 = vmatmul.mubr.f32.gmra.mrb[8].mxu1 %v80_v4 }
  0x7a   :  { %225 = vmatprep.mubr.f32.mxu0 %v51_v5  ;;  %305 = vmatprep.mubr.f32.mxu1 %v83_v6 }
  0x7d   :  { %226 = vmatmul.mubr.f32.gmra.mrb[10].mxu0 %v50_v7  ;;  %306 = vmatmul.mubr.f32.gmra.mrb[10].mxu1 %v82_v8 }
  0x7e   :  { %230 = vmatprep.mubr.f32.mxu0 %v53_v9  ;;  %310 = vmatprep.mubr.f32.mxu1 %v85_v10 }
  0x81   :  { %231 = vmatmul.mubr.f32.gmra.mrb[12].mxu0 %v52_v11  ;;  %311 = vmatmul.mubr.f32.gmra.mrb[12].mxu1 %v84_v12 }
  0x82   :  { %235 = vmatprep.mubr.f32.mxu0 %v55_v13  ;;  %315 = vmatprep.mubr.f32.mxu1 %v87_v14 }
  0x85   :  { %236 = vmatmul.mubr.f32.gmra.mrb[14].mxu0 %v54_v15  ;;  %316 = vmatmul.mubr.f32.gmra.mrb[14].mxu1 %v86_v16 }
  0x86   :  { %240 = vmatprep.mubr.f32.mxu0 %v57_v17  ;;  %320 = vmatprep.mubr.f32.mxu1 %v89_v18 }
  0x89   :  { %241 = vmatmul.mubr.f32.gmra.mrb[16].mxu0 %v56_v19  ;;  %321 = vmatmul.mubr.f32.gmra.mrb[16].mxu1 %v88_v20 }
  0x8a   :  { %245 = vmatprep.mubr.f32.mxu0 %v59_v21  ;;  %325 = vmatprep.mubr.f32.mxu1 %v91_v22 }
  0x8d   :  { %246 = vmatmul.mubr.f32.gmra.mrb[18].mxu0 %v58_v23  ;;  %326 = vmatmul.mubr.f32.gmra.mrb[18].mxu1 %v90_v24 }
  0x8e   :  { %250 = vmatprep.mubr.f32.mxu0 %v61_v25  ;;  %330 = vmatprep.mubr.f32.mxu1 %v93_v26 }
  0x91   :  { %251 = vmatmul.mubr.f32.gmra.mrb[20].mxu0 %v60_v27  ;;  %331 = vmatmul.mubr.f32.gmra.mrb[20].mxu1 %v92_v28 }
  0x92   :  { %255 = vmatprep.mubr.f32.mxu0 %v63_v29  ;;  %335 = vmatprep.mubr.f32.mxu1 %v95_v30 }
  0x95   :  { %256 = vmatmul.mubr.f32.gmra.mrb[22].mxu0 %v62_v31  ;;  %336 = vmatmul.mubr.f32.gmra.mrb[22].mxu1 %v94_v32 }
  0x96   :  { %260 = vmatprep.mubr.f32.mxu0 %v65_v33  ;;  %340 = vmatprep.mubr.f32.mxu1 %v97_v34 }
  0x99   :  { %261 = vmatmul.mubr.f32.gmra.mrb[24].mxu0 %v64_v35  ;;  %341 = vmatmul.mubr.f32.gmra.mrb[24].mxu1 %v96_v36 }
  0x9a   :  { %265 = vmatprep.mubr.f32.mxu0 %v67_v37  ;;  %345 = vmatprep.mubr.f32.mxu1 %v99_v38 }
  0x9d   :  { %266 = vmatmul.mubr.f32.gmra.mrb[26].mxu0 %v66_v39  ;;  %346 = vmatmul.mubr.f32.gmra.mrb[26].mxu1 %v98_v40 }
  0x9e   :  { %270 = vmatprep.mubr.f32.mxu0 %v69_v41  ;;  %350 = vmatprep.mubr.f32.mxu1 %v101_v42 }
  0xa1   :  { %271 = vmatmul.mubr.f32.gmra.mrb[28].mxu0 %v68_v43  ;;  %351 = vmatmul.mubr.f32.gmra.mrb[28].mxu1 %v100_v44 }
  0xa2   :  { %275 = vmatprep.mubr.f32.mxu0 %v71_v45  ;;  %355 = vmatprep.mubr.f32.mxu1 %v103_v46 }
  0xa5   :  { %276 = vmatmul.mubr.f32.gmra.mrb[30].mxu0 %v70_v47  ;;  %356 = vmatmul.mubr.f32.gmra.mrb[30].mxu1 %v102_v48 }
 0x13c   :  { %v202_v49 = vpop.f32.mrb[0].mxu0  ;;  %v282_v50 = vpop.f32.mrb[0].mxu1 }
 0x13d   :  { %v361_v51 = vmax.f32 %v202_v49, 0.0  ;;  %v377_v52 = vmax.f32 %v282_v50, 0.0  ;;  %v204_v53 = vpop.f32.mrb[1].mxu0  ;;  %v284_v54 = vpop.f32.mrb[1].mxu1 }
 0x13f   :  { %393 = vst [vmem:[#allocation7] sm:$0xff] %v361_v51  ;;  %409 = vst [vmem:[#allocation7 + $0x80] sm:$0xff] %v377_v52 }
 0x140   :  { %v207_v55 = vpop.f32.mrb[2].mxu0  ;;  %v287_v56 = vpop.f32.mrb[2].mxu1 }
 0x141   :  { %v362_v57 = vmax.f32 %v207_v55, 0.0  ;;  %v378_v58 = vmax.f32 %v287_v56, 0.0  ;;  %v209_v59 = vpop.f32.mrb[3].mxu0  ;;  %v289_v60 = vpop.f32.mrb[3].mxu1 }
 0x143   :  { %394 = vst [vmem:[#allocation7 + $0x8] sm:$0xff] %v362_v57  ;;  %410 = vst [vmem:[#allocation7 + $0x88] sm:$0xff] %v378_v58 }
 0x144   :  { %v212_v61 = vpop.f32.mrb[4].mxu0  ;;  %v292_v62 = vpop.f32.mrb[4].mxu1 }
 0x145   :  { %v363_v63 = vmax.f32 %v212_v61, 0.0  ;;  %v379_v0 = vmax.f32 %v292_v62, 0.0  ;;  %v214_v1 = vpop.f32.mrb[5].mxu0  ;;  %v294_v2 = vpop.f32.mrb[5].mxu1 }
 0x147   :  { %395 = vst [vmem:[#allocation7 + $0x10] sm:$0xff] %v363_v63  ;;  %411 = vst [vmem:[#allocation7 + $0x90] sm:$0xff] %v379_v0 }
 0x148   :  { %v217_v3 = vpop.f32.mrb[6].mxu0  ;;  %v297_v4 = vpop.f32.mrb[6].mxu1 }
 0x149   :  { %v364_v5 = vmax.f32 %v217_v3, 0.0  ;;  %v380_v6 = vmax.f32 %v297_v4, 0.0  ;;  %v219_v7 = vpop.f32.mrb[7].mxu0  ;;  %v299_v8 = vpop.f32.mrb[7].mxu1 }
 0x14b   :  { %396 = vst [vmem:[#allocation7 + $0x18] sm:$0xff] %v364_v5  ;;  %412 = vst [vmem:[#allocation7 + $0x98] sm:$0xff] %v380_v6 }
 0x14c   :  { %v222_v9 = vpop.f32.mrb[8].mxu0  ;;  %v302_v10 = vpop.f32.mrb[8].mxu1 }
 0x14d   :  { %v365_v11 = vmax.f32 %v222_v9, 0.0  ;;  %v381_v12 = vmax.f32 %v302_v10, 0.0  ;;  %v224_v13 = vpop.f32.mrb[9].mxu0  ;;  %v304_v14 = vpop.f32.mrb[9].mxu1 }
 0x14f   :  { %397 = vst [vmem:[#allocation7 + $0x20] sm:$0xff] %v365_v11  ;;  %413 = vst [vmem:[#allocation7 + $0xa0] sm:$0xff] %v381_v12 }
 0x150   :  { %v227_v15 = vpop.f32.mrb[10].mxu0  ;;  %v307_v16 = vpop.f32.mrb[10].mxu1 }
 0x151   :  { %v366_v17 = vmax.f32 %v227_v15, 0.0  ;;  %v382_v18 = vmax.f32 %v307_v16, 0.0  ;;  %v229_v19 = vpop.f32.mrb[11].mxu0  ;;  %v309_v20 = vpop.f32.mrb[11].mxu1 }
 0x153   :  { %398 = vst [vmem:[#allocation7 + $0x28] sm:$0xff] %v366_v17  ;;  %414 = vst [vmem:[#allocation7 + $0xa8] sm:$0xff] %v382_v18 }
 0x154   :  { %v232_v21 = vpop.f32.mrb[12].mxu0  ;;  %v312_v22 = vpop.f32.mrb[12].mxu1 }
 0x155   :  { %v367_v23 = vmax.f32 %v232_v21, 0.0  ;;  %v383_v24 = vmax.f32 %v312_v22, 0.0  ;;  %v234_v25 = vpop.f32.mrb[13].mxu0  ;;  %v314_v26 = vpop.f32.mrb[13].mxu1 }
 0x157   :  { %399 = vst [vmem:[#allocation7 + $0x30] sm:$0xff] %v367_v23  ;;  %415 = vst [vmem:[#allocation7 + $0xb0] sm:$0xff] %v383_v24 }
 0x158   :  { %v237_v27 = vpop.f32.mrb[14].mxu0  ;;  %v317_v28 = vpop.f32.mrb[14].mxu1 }
 0x159   :  { %v368_v29 = vmax.f32 %v237_v27, 0.0  ;;  %v384_v30 = vmax.f32 %v317_v28, 0.0  ;;  %v239_v31 = vpop.f32.mrb[15].mxu0  ;;  %v319_v32 = vpop.f32.mrb[15].mxu1 }
 0x15b   :  { %400 = vst [vmem:[#allocation7 + $0x38] sm:$0xff] %v368_v29  ;;  %416 = vst [vmem:[#allocation7 + $0xb8] sm:$0xff] %v384_v30 }
 0x15c   :  { %v242_v33 = vpop.f32.mrb[16].mxu0  ;;  %v322_v34 = vpop.f32.mrb[16].mxu1 }
 0x15d   :  { %v369_v35 = vmax.f32 %v242_v33, 0.0  ;;  %v385_v36 = vmax.f32 %v322_v34, 0.0  ;;  %v244_v37 = vpop.f32.mrb[17].mxu0  ;;  %v324_v38 = vpop.f32.mrb[17].mxu1 }
 0x15f   :  { %401 = vst [vmem:[#allocation7 + $0x40] sm:$0xff] %v369_v35  ;;  %417 = vst [vmem:[#allocation7 + $0xc0] sm:$0xff] %v385_v36 }
 0x160   :  { %v247_v39 = vpop.f32.mrb[18].mxu0  ;;  %v327_v40 = vpop.f32.mrb[18].mxu1 }
 0x161   :  { %v370_v41 = vmax.f32 %v247_v39, 0.0  ;;  %v386_v42 = vmax.f32 %v327_v40, 0.0  ;;  %v249_v43 = vpop.f32.mrb[19].mxu0  ;;  %v329_v44 = vpop.f32.mrb[19].mxu1 }
 0x163   :  { %402 = vst [vmem:[#allocation7 + $0x48] sm:$0xff] %v370_v41  ;;  %418 = vst [vmem:[#allocation7 + $0xc8] sm:$0xff] %v386_v42 }
 0x164   :  { %v252_v45 = vpop.f32.mrb[20].mxu0  ;;  %v332_v46 = vpop.f32.mrb[20].mxu1 }
 0x165   :  { %v371_v47 = vmax.f32 %v252_v45, 0.0  ;;  %v387_v48 = vmax.f32 %v332_v46, 0.0  ;;  %v254_v49 = vpop.f32.mrb[21].mxu0  ;;  %v334_v50 = vpop.f32.mrb[21].mxu1 }
 0x167   :  { %403 = vst [vmem:[#allocation7 + $0x50] sm:$0xff] %v371_v47  ;;  %419 = vst [vmem:[#allocation7 + $0xd0] sm:$0xff] %v387_v48 }
 0x168   :  { %v257_v51 = vpop.f32.mrb[22].mxu0  ;;  %v337_v52 = vpop.f32.mrb[22].mxu1 }
 0x169   :  { %v372_v53 = vmax.f32 %v257_v51, 0.0  ;;  %v388_v54 = vmax.f32 %v337_v52, 0.0  ;;  %v259_v55 = vpop.f32.mrb[23].mxu0  ;;  %v339_v56 = vpop.f32.mrb[23].mxu1 }
 0x16b   :  { %404 = vst [vmem:[#allocation7 + $0x58] sm:$0xff] %v372_v53  ;;  %420 = vst [vmem:[#allocation7 + $0xd8] sm:$0xff] %v388_v54 }
 0x16c   :  { %v262_v57 = vpop.f32.mrb[24].mxu0  ;;  %v342_v58 = vpop.f32.mrb[24].mxu1 }
 0x16d   :  { %v373_v59 = vmax.f32 %v262_v57, 0.0  ;;  %v389_v60 = vmax.f32 %v342_v58, 0.0  ;;  %v264_v61 = vpop.f32.mrb[25].mxu0  ;;  %v344_v62 = vpop.f32.mrb[25].mxu1 }
 0x16f   :  { %405 = vst [vmem:[#allocation7 + $0x60] sm:$0xff] %v373_v59  ;;  %421 = vst [vmem:[#allocation7 + $0xe0] sm:$0xff] %v389_v60 }
 0x170   :  { %v267_v63 = vpop.f32.mrb[26].mxu0  ;;  %v347_v0 = vpop.f32.mrb[26].mxu1 }
 0x171   :  { %v374_v1 = vmax.f32 %v267_v63, 0.0  ;;  %v390_v2 = vmax.f32 %v347_v0, 0.0  ;;  %v269_v3 = vpop.f32.mrb[27].mxu0  ;;  %v349_v4 = vpop.f32.mrb[27].mxu1 }
 0x173   :  { %406 = vst [vmem:[#allocation7 + $0x68] sm:$0xff] %v374_v1  ;;  %422 = vst [vmem:[#allocation7 + $0xe8] sm:$0xff] %v390_v2 }
 0x174   :  { %v272_v5 = vpop.f32.mrb[28].mxu0  ;;  %v352_v6 = vpop.f32.mrb[28].mxu1 }
 0x175   :  { %v375_v7 = vmax.f32 %v272_v5, 0.0  ;;  %v391_v8 = vmax.f32 %v352_v6, 0.0  ;;  %v274_v9 = vpop.f32.mrb[29].mxu0  ;;  %v354_v10 = vpop.f32.mrb[29].mxu1 }
 0x177   :  { %407 = vst [vmem:[#allocation7 + $0x70] sm:$0xff] %v375_v7  ;;  %423 = vst [vmem:[#allocation7 + $0xf0] sm:$0xff] %v391_v8 }
 0x178   :  { %v277_v11 = vpop.f32.mrb[30].mxu0  ;;  %v357_v12 = vpop.f32.mrb[30].mxu1 }
 0x179   :  { %v376_v13 = vmax.f32 %v277_v11, 0.0  ;;  %v392_v14 = vmax.f32 %v357_v12, 0.0  ;;  %v279_v15 = vpop.f32.mrb[31].mxu0  ;;  %v359_v16 = vpop.f32.mrb[31].mxu1 }
 0x17b   :  { %408 = vst [vmem:[#allocation7 + $0x78] sm:$0xff] %v376_v13  ;;  %424 = vst [vmem:[#allocation7 + $0xf8] sm:$0xff] %v392_v14 }
 0x17c   :  { %586 = shalt.err (!%p583_p6)
}
 0x17d   :  { %s587_s12 = scalar_lea.hbm %s702_s2, 4096 }
 0x17e   :  { %p588_p7 = scmp.ne.s32.totalorder %s702_s2, %s587_s12  ;;  %p591_p8 = scmp.lt.u32.totalorder %s587_s12, %s702_s2 }
 0x180   :  { %p593_p9 = pnand %p591_p8, %p588_p7 }
 0x182   :  { %596 = shalt.err (!%p593_p9)
}
 0x183   :  { %436 = dma.vmem_to_hbm [thread:$0]  %s431_s8, 4096, %s702_s2, [#allocation4], %s607_s0, %s607_s0, %s608_s5  }
 0x184   :  { %601 = dma.done.wait [#allocation4], 4096  }
 0x185   :  { %602 = vsyncadd [#allocation4], 4294963200 }
 0x186   :  { %440 = vsyncpa [#allocation3], 1 }
 0x187   :  { %441 = vsyncpa [#allocation6], 1 }
 0x188   :  { %442 = vsyncpa [#allocation4], 1 }

</bundles_post_ra>
